<compile_context>
chip_gen: v7x
topology: tpu7x:2x2x1
jax: 0.10.0
libtpu: 0.0.40
codegen_flags: <defaults>
</compile_context>

<pallas_src>
import math

import jax
import jax.numpy as jnp
from jax.experimental import pallas as pl
from jax.experimental.pallas import tpu as pltpu


def _round_up(n, m):
    return ((n + m - 1) // m) * m


def mlp_kernel(x_ref, w1_ref, b1_ref, w2_ref, b2_ref, o_ref):
    # fc1: [TB, F] @ [F, H_pad]  -- bf16 MXU inputs, f32 accumulation.
    x = x_ref[...].astype(w1_ref.dtype)
    h = jnp.dot(x, w1_ref[...], preferred_element_type=jnp.float32)
    # Bias + ReLU kept in f32 (safe on v5e's bf16-less VPU).
    h = jnp.maximum(h + b1_ref[...], 0.0)
    # fc2: [TB, H_pad] @ [H_pad, C_pad]  -- lane-dense contraction and output.
    y = jnp.dot(h.astype(w2_ref.dtype), w2_ref[...],
                preferred_element_type=jnp.float32)
    o_ref[...] = (y + b2_ref[...]).astype(o_ref.dtype)


def prepare_params(w1, b1, w2, b2, *, weight_dtype=jnp.bfloat16):
    """One-time param prep (hoisted out of the forward pass).

    Pads the hidden dim H and class dim C to multiples of 128 (lane-dense) and
    casts weights to `weight_dtype` (bf16 by default; pass None to keep f32).
    Padded weight entries are exact zeros, so results are unchanged.
    """
    F, H = w1.shape
    C = w2.shape[1]
    H_pad = _round_up(max(H, 128), 128)
    C_pad = _round_up(max(C, 128), 128)
    wd = w1.dtype if weight_dtype is None else weight_dtype

    w1_p = jnp.zeros((F, H_pad), wd).at[:, :H].set(w1.astype(wd))
    b1_p = jnp.zeros((1, H_pad), jnp.float32).at[0, :H].set(b1.astype(jnp.float32))
    w2_p = jnp.zeros((H_pad, C_pad), wd).at[:H, :C].set(w2.astype(wd))
    b2_p = jnp.zeros((1, C_pad), jnp.float32).at[0, :C].set(b2.astype(jnp.float32))
    return w1_p, b1_p, w2_p, b2_p


def net_forward(x, w1_p, b1_p, w2_p, b2_p, n_classes, *, block_rows=1024):
    """y = relu(x @ w1 + b1) @ w2 + b2 using the pre-padded params.

    x: [B, F] f32; w1_p: [F, H_pad]; b1_p: [1, H_pad]; w2_p: [H_pad, C_pad];
    b2_p: [1, C_pad].  Returns [B, n_classes].
    """
    B, F = x.shape
    H_pad = w1_p.shape[1]
    C_pad = w2_p.shape[1]

    # Batch tile: large (fewer ~0.35us grid steps), multiple of 8 sublanes.
    # No x padding: grid = cdiv(B, TB); Pallas masks the ragged tail block.
    # TODO(synk): for very large B on v7x, size TB for an even (2-per-TC) grid.
    TB = _round_up(min(block_rows, B), 8)
    grid = (pl.cdiv(B, TB),)

    out = pl.pallas_call(
        mlp_kernel,
        out_shape=jax.ShapeDtypeStruct((B, C_pad), x.dtype),
        grid=grid,
        in_specs=[
            # Activations stream per grid step (double-buffered by Pallas).
            pl.BlockSpec((TB, F), lambda i: (i, 0)),
            # Weights / biases pinned: same block every step -> VMEM-resident.
            pl.BlockSpec((F, H_pad), lambda i: (0, 0)),
            pl.BlockSpec((1, H_pad), lambda i: (0, 0)),
            pl.BlockSpec((H_pad, C_pad), lambda i: (0, 0)),
            pl.BlockSpec((1, C_pad), lambda i: (0, 0)),
        ],
        out_specs=pl.BlockSpec((TB, C_pad), lambda i: (i, 0)),
        compiler_params=pltpu.CompilerParams(
            dimension_semantics=("parallel",),   # shard batch tiles across TCs
            vmem_limit_bytes=48 * 1024 * 1024,   # headroom under v7x's 64 MiB
        ),
    )(x, w1_p, b1_p, w2_p, b2_p)

    # Only the tiny class-dim slice remains on the wrapper side.
    return out[:, :n_classes]


def trunc_normal(key, shape, std):
    # Deterministic stand-in for truncated_normal_init_ (trunc at +/-2 sigma).
    return std * jax.random.truncated_normal(key, -2.0, 2.0, shape, jnp.float32)


if __name__ == "__main__":
    # Small shapes consistent with the module's forward.
    batch, feature_dim, hidden_dim, n_classes = 200, 32, 32, 8

    key = jax.random.PRNGKey(0)
    kx, kw1, kb1, kw2, kb2 = jax.random.split(key, 5)

    std1 = 2.0 / math.sqrt(feature_dim + hidden_dim)
    std2 = 2.0 / math.sqrt(hidden_dim + n_classes)

    x = jax.random.normal(kx, (batch, feature_dim), jnp.float32)
    # Weights kept as [in, out] (transposed vs torch's [out, in]).
    w1 = trunc_normal(kw1, (feature_dim, hidden_dim), std1)
    b1 = trunc_normal(kb1, (hidden_dim,), std1)
    w2 = trunc_normal(kw2, (hidden_dim, n_classes), std2)
    b2 = trunc_normal(kb2, (n_classes,), std2)

    # One-time param prep (padding + bf16 cast), then a single forward call.
    w1_p, b1_p, w2_p, b2_p = prepare_params(w1, b1, w2, b2,
                                            weight_dtype=jnp.bfloat16)
    out = net_forward(x, w1_p, b1_p, w2_p, b2_p, n_classes)
    out = jax.block_until_ready(out)
    assert out.shape == (batch, n_classes)

    # Reference mirroring the kernel's bf16-input / f32-accumulate numerics.
    h_ref = jnp.maximum(
        jnp.dot(x.astype(jnp.bfloat16), w1.astype(jnp.bfloat16),
                preferred_element_type=jnp.float32) + b1, 0.0)
    ref = jnp.dot(h_ref.astype(jnp.bfloat16), w2.astype(jnp.bfloat16),
                  preferred_element_type=jnp.float32) + b2
    assert jnp.allclose(out, ref, atol=2e-3, rtol=2e-3)

    # Loose sanity check against the pure-f32 math (bf16 rounding drift only).
    ref_f32 = jnp.maximum(x @ w1 + b1, 0.0) @ w2 + b2
    assert jnp.allclose(out, ref_f32, atol=5e-2, rtol=5e-2)

    print("KERNEL_OK")
</pallas_src>

<mosaic_0001>
module attributes {stable_mosaic.version = 11 : i64} {
  func.func @mlp_kernel(%arg0: i32, %arg1: memref<200x32xf32, #tpu.memory_space<vmem>>, %arg2: memref<32x128xbf16, #tpu.memory_space<vmem>>, %arg3: memref<1x128xf32, #tpu.memory_space<vmem>>, %arg4: memref<128x128xbf16, #tpu.memory_space<vmem>>, %arg5: memref<1x128xf32, #tpu.memory_space<vmem>>, %arg6: memref<200x128xf32, #tpu.memory_space<vmem>>) attributes {dimension_semantics = [#tpu.dimension_semantics<parallel>], iteration_bounds = array<i64: 1>, scalar_prefetch = 0 : i64, scratch_operands = 0 : i64, tpu.core_type = #tpu.core_type<tc>, window_params = [{transform_indices = @transform_0, window_bounds = array<i64: 200, 32>}, {pipeline_mode = #tpu.pipeline_mode<synchronous>, transform_indices = @transform_1, window_bounds = array<i64: 32, 128>}, {pipeline_mode = #tpu.pipeline_mode<synchronous>, transform_indices = @transform_2, window_bounds = array<i64: 1, 128>}, {pipeline_mode = #tpu.pipeline_mode<synchronous>, transform_indices = @transform_3, window_bounds = array<i64: 128, 128>}, {pipeline_mode = #tpu.pipeline_mode<synchronous>, transform_indices = @transform_4, window_bounds = array<i64: 1, 128>}, {transform_indices = @transform_5, window_bounds = array<i64: 200, 128>}]} {
    %c0 = arith.constant 0 : index
    %c0_0 = arith.constant 0 : index
    %0 = vector.load %arg1[%c0, %c0_0] : memref<200x32xf32, #tpu.memory_space<vmem>>, vector<200x32xf32>
    %1 = arith.truncf %0 : vector<200x32xf32> to vector<200x32xbf16>
    %c0_1 = arith.constant 0 : index
    %c0_2 = arith.constant 0 : index
    %2 = vector.load %arg2[%c0_1, %c0_2] : memref<32x128xbf16, #tpu.memory_space<vmem>>, vector<32x128xbf16>
    %cst = arith.constant dense<0.000000e+00> : vector<200x128xf32>
    %3 = tpu.matmul %1, %2, %cst {dimension_numbers = #tpu.dot_dimension_numbers<[1], [0], [0], [1], [0, 0, 1, 1], [], []>} : vector<200x32xbf16>, vector<32x128xbf16>, vector<200x128xf32> -> vector<200x128xf32>
    %c0_3 = arith.constant 0 : index
    %c0_4 = arith.constant 0 : index
    %4 = vector.load %arg3[%c0_3, %c0_4] : memref<1x128xf32, #tpu.memory_space<vmem>>, vector<1x128xf32>
    %5 = vector.broadcast %4 : vector<1x128xf32> to vector<200x128xf32>
    %6 = arith.addf %3, %5 : vector<200x128xf32>
    %cst_5 = arith.constant 0.000000e+00 : f32
    %7 = vector.broadcast %cst_5 : f32 to vector<200x128xf32>
    %8 = arith.maximumf %6, %7 : vector<200x128xf32>
    %9 = arith.truncf %8 : vector<200x128xf32> to vector<200x128xbf16>
    %c0_6 = arith.constant 0 : index
    %c0_7 = arith.constant 0 : index
    %10 = vector.load %arg4[%c0_6, %c0_7] : memref<128x128xbf16, #tpu.memory_space<vmem>>, vector<128x128xbf16>
    %cst_8 = arith.constant dense<0.000000e+00> : vector<200x128xf32>
    %11 = tpu.matmul %9, %10, %cst_8 {dimension_numbers = #tpu.dot_dimension_numbers<[1], [0], [0], [1], [0, 0, 1, 1], [], []>} : vector<200x128xbf16>, vector<128x128xbf16>, vector<200x128xf32> -> vector<200x128xf32>
    %c0_9 = arith.constant 0 : index
    %c0_10 = arith.constant 0 : index
    %12 = vector.load %arg5[%c0_9, %c0_10] : memref<1x128xf32, #tpu.memory_space<vmem>>, vector<1x128xf32>
    %13 = vector.broadcast %12 : vector<1x128xf32> to vector<200x128xf32>
    %14 = arith.addf %11, %13 : vector<200x128xf32>
    %c0_11 = arith.constant 0 : index
    %c0_12 = arith.constant 0 : index
    %15 = vector.load %arg6[%c0_11, %c0_12] : memref<200x128xf32, #tpu.memory_space<vmem>>, vector<200x128xf32>
    tpu.vector_store %arg6[%c0_11, %c0_12], %14 {strides = array<i32>} : memref<200x128xf32, #tpu.memory_space<vmem>>, vector<200x128xf32>,
    return
  }
  func.func @transform_0(%arg0: i32) -> (i32, i32) {
    %c0_i32 = arith.constant 0 : i32
    %c0_i32_0 = arith.constant 0 : i32
    return %arg0, %c0_i32 : i32, i32
  }
  func.func @transform_1(%arg0: i32) -> (i32, i32) {
    %c0_i32 = arith.constant 0 : i32
    %c0_i32_0 = arith.constant 0 : i32
    %c0_i32_1 = arith.constant 0 : i32
    return %c0_i32, %c0_i32_0 : i32, i32
  }
  func.func @transform_2(%arg0: i32) -> (i32, i32) {
    %c0_i32 = arith.constant 0 : i32
    %c0_i32_0 = arith.constant 0 : i32
    %c0_i32_1 = arith.constant 0 : i32
    return %c0_i32, %c0_i32_0 : i32, i32
  }
  func.func @transform_3(%arg0: i32) -> (i32, i32) {
    %c0_i32 = arith.constant 0 : i32
    %c0_i32_0 = arith.constant 0 : i32
    %c0_i32_1 = arith.constant 0 : i32
    return %c0_i32, %c0_i32_0 : i32, i32
  }
  func.func @transform_4(%arg0: i32) -> (i32, i32) {
    %c0_i32 = arith.constant 0 : i32
    %c0_i32_0 = arith.constant 0 : i32
    %c0_i32_1 = arith.constant 0 : i32
    return %c0_i32, %c0_i32_0 : i32, i32
  }
  func.func @transform_5(%arg0: i32) -> (i32, i32) {
    %c0_i32 = arith.constant 0 : i32
    %c0_i32_0 = arith.constant 0 : i32
    return %arg0, %c0_i32 : i32, i32
  }
}

</mosaic_0001>

<bundles_post_ra>
// kernel: tpu_custom_call.1
= control target key start
LH: loop header
LB: loop body
LE: loop exit
PB: predicated region body
PF: predicated region fallthrough
CT: control target
= control target key end

     0   :  { %v785_v1 = vmov 0.0   ;;  %vm786_vm0 = vmmov 0   ;;  %vm83_vm1 = vcmask 261120   ;;  %s1080_s0 = inlined_call_operand.vmem [shape: f32[200,32], index: 0, kind: input, shape index: {}]   ;;  %s1081_s1 = inlined_call_operand.vmem [shape: bf16[32,128], index: 1, kind: input, shape index: {}]   ;;  %s1082_s2 = inlined_call_operand.vmem [shape: f32[1,128], index: 2, kind: input, shape index: {}]   ;;  %s1083_s3 = inlined_call_operand.vmem [shape: bf16[128,128], index: 3, kind: input, shape index: {}]   ;;  %s1084_s4 = inlined_call_operand.vmem [shape: f32[1,128], index: 4, kind: input, shape index: {}]   ;;  %s1085_s5 = inlined_call_operand.hbm [shape: f32[200,128], index: 5, kind: output, shape index: {}]  }
   0x1   :  { %v751_v0 = vld [vmem:[%s1081_s1] sm:$0xff]   ;;  %606 = vmatprep.subr.bf16.mxu0 %v785_v1  ;;  %730 = vmatprep.subr.bf16.mxu1 %v785_v1  ;;  %v752_v2 = vld [vmem:[%s1081_s1 + $0x8] sm:$0xff]   ;;  %v24_v6 = vld [vmem:[%s1080_s0 + $0x10] sm:$0xff] }
   0x2   :  { %607 = vmatpush3.bf16.msra.mxu0 %v751_v0  ;;  %610 = vmatprep.mubr.msk.bf16.mxu0 %vm786_vm0, %v785_v1  ;;  %v22_v3 = vld [vmem:[%s1080_s0] sm:$0xff]  ;;  %v23_v4 = vld [vmem:[%s1080_s0 + $0x8] sm:$0xff]  ;;  %v25_v7 = vld [vmem:[%s1080_s0 + $0x18] sm:$0xff] }
   0x3   :  { %608 = vmatprep.subr.bf16.mxu0 %v785_v1  ;;  %682 = vmatprep.mubr.msk.bf16.mxu1 %vm786_vm0, %v785_v1  ;;  %v47_v5 = vpack.c.bf16 %v23_v4, %v22_v3  ;;  %v753_v8 = vld [vmem:[%s1083_s3] sm:$0xff]   ;;  %v48_v9 = vpack.c.bf16 %v25_v7, %v24_v6  ;;  %v754_v10 = vld [vmem:[%s1083_s3 + $0x8] sm:$0xff]   ;;  %v755_v13 = vld [vmem:[%s1083_s3 + $0x10] sm:$0xff]  }
   0x4   :  { %738 = vmatpush3.bf16.msra.mxu1 %v753_v8  ;;  %v26_v11 = vld [vmem:[%s1080_s0 + $0x20] sm:$0xff]  ;;  %v27_v12 = vld [vmem:[%s1080_s0 + $0x28] sm:$0xff] }
   0x5   :  { %731 = vmatprep.subr.bf16.mxu1 %v785_v1 }
   0x6   :  { %609 = vmatpush3.bf16.msra.mxu0 %v752_v2 }
   0x7   :  { %662 = vmatprep.subr.bf16.mxu0 %v785_v1 }
   0x8   :  { %739 = vmatpush3.bf16.msra.mxu1 %v754_v10 }
   0x9   :  { %611 = vmatmul.mubr.msk.bf16.vlgmr.msra.gmra.mrb[0].mxu0 %vm83_vm1, %v47_v5 }
   0xa   :  { %614 = vmatprep.mubr.msk.bf16.mxu0 %vm786_vm0, %v785_v1  ;;  %663 = vmatpush3.bf16.msra.mxu0 %v753_v8 }
   0xb   :  { %664 = vmatprep.subr.bf16.mxu0 %v785_v1 }
   0xe   :  { %665 = vmatpush3.bf16.msra.mxu0 %v754_v10 }
  0x11   :  { %615 = vmatmul.mubr.msk.bf16.gmra.mrb[4].mxu0 %vm83_vm1, %v48_v9 }
  0x12   :  { %618 = vmatprep.mubr.msk.bf16.mxu0 %vm786_vm0, %v785_v1 }
  0x13   :  { %10 = vsyncpa [#allocation3], 0  ;;  %666 = vmatprep.subr.bf16.mxu0 %v785_v1  ;;  %732 = vmatprep.subr.bf16.mxu1 %v785_v1  ;;  %v49_v14 = vpack.c.bf16 %v27_v12, %v26_v11  ;;  %v756_v15 = vld [vmem:[%s1083_s3 + $0x18] sm:$0xff]   ;;  %v28_v16 = vld [vmem:[%s1080_s0 + $0x30] sm:$0xff] }
  0x14   :  { %740 = vmatpush3.bf16.msra.mxu1 %v755_v13  ;;  %667 = vmatpush3.bf16.msra.mxu0 %v755_v13  ;;  %v29_v17 = vld [vmem:[%s1080_s0 + $0x38] sm:$0xff]  ;;  %v757_v18 = vld [vmem:[%s1083_s3 + $0x20] sm:$0xff]   ;;  %v758_v20 = vld [vmem:[%s1083_s3 + $0x28] sm:$0xff]  }
  0x15   :  { %733 = vmatprep.subr.bf16.mxu1 %v785_v1  ;;  %668 = vmatprep.subr.bf16.mxu0 %v785_v1  ;;  %v50_v19 = vpack.c.bf16 %v29_v17, %v28_v16  ;;  %v30_v21 = vld [vmem:[%s1080_s0 + $0x40] sm:$0xff]  ;;  %v31_v22 = vld [vmem:[%s1080_s0 + $0x48] sm:$0xff]  ;;  %v32_v24 = vld [vmem:[%s1080_s0 + $0x50] sm:$0xff] }
  0x16   :  { %v51_v23 = vpack.c.bf16 %v31_v22, %v30_v21  ;;  %v33_v25 = vld [vmem:[%s1080_s0 + $0x58] sm:$0xff]  ;;  %v34_v27 = vld [vmem:[%s1080_s0 + $0x60] sm:$0xff]  ;;  %v35_v28 = vld [vmem:[%s1080_s0 + $0x68] sm:$0xff] }
  0x17   :  { %v52_v26 = vpack.c.bf16 %v33_v25, %v32_v24  ;;  %v53_v29 = vpack.c.bf16 %v35_v28, %v34_v27  ;;  %v36_v30 = vld [vmem:[%s1080_s0 + $0x70] sm:$0xff]  ;;  %v37_v31 = vld [vmem:[%s1080_s0 + $0x78] sm:$0xff]  ;;  %v38_v33 = vld [vmem:[%s1080_s0 + $0x80] sm:$0xff] }
  0x18   :  { %741 = vmatpush3.bf16.msra.mxu1 %v756_v15  ;;  %669 = vmatpush3.bf16.msra.mxu0 %v756_v15  ;;  %v54_v32 = vpack.c.bf16 %v37_v31, %v36_v30  ;;  %v39_v34 = vld [vmem:[%s1080_s0 + $0x88] sm:$0xff]  ;;  %v40_v36 = vld [vmem:[%s1080_s0 + $0x90] sm:$0xff]  ;;  %v41_v37 = vld [vmem:[%s1080_s0 + $0x98] sm:$0xff] }
  0x19   :  { %619 = vmatmul.mubr.msk.bf16.gmra.mrb[8].mxu0 %vm83_vm1, %v49_v14  ;;  %670 = vmatprep.subr.bf16.mxu0 %v785_v1  ;;  %v55_v35 = vpack.c.bf16 %v39_v34, %v38_v33  ;;  %v56_v38 = vpack.c.bf16 %v41_v37, %v40_v36  ;;  %v42_v39 = vld [vmem:[%s1080_s0 + $0xa0] sm:$0xff]  ;;  %v43_v40 = vld [vmem:[%s1080_s0 + $0xa8] sm:$0xff]  ;;  %v44_v42 = vld [vmem:[%s1080_s0 + $0xb0] sm:$0xff] }
  0x1a   :  { %622 = vmatprep.mubr.msk.bf16.mxu0 %vm786_vm0, %v785_v1  ;;  %734 = vmatprep.subr.bf16.mxu1 %v785_v1  ;;  %v57_v41 = vpack.c.bf16 %v43_v40, %v42_v39  ;;  %v45_v43 = vld [vmem:[%s1080_s0 + $0xb8] sm:$0xff]  ;;  %v759_v44 = vld [vmem:[%s1083_s3 + $0x30] sm:$0xff]   ;;  %v46_v47 = vld [vmem:[%s1080_s0 + $0xc0] sm:$0xff] }
  0x1b   :  { %v58_v45 = vpack.c.bf16 %v45_v43, %v44_v42  ;;  %v760_v46 = vld [vmem:[%s1083_s3 + $0x38] sm:$0xff]   ;;  %v59_v48 = vpack.c.bf16 %v46_v47, %v46_v47  ;;  %v989_v49 = vld [vmem:[%s1082_s2] ss:$0 sm:$0xff]  ;;  %s787_s3 = smov [#allocation2]  }
  0x1c   :  { %742 = vmatpush3.bf16.msra.mxu1 %v757_v18  ;;  %671 = vmatpush3.bf16.msra.mxu0 %v757_v18 }
  0x1d   :  { %735 = vmatprep.subr.bf16.mxu1 %v785_v1  ;;  %672 = vmatprep.subr.bf16.mxu0 %v785_v1 }
  0x20   :  { %743 = vmatpush3.bf16.msra.mxu1 %v758_v20  ;;  %673 = vmatpush3.bf16.msra.mxu0 %v758_v20 }
  0x21   :  { %623 = vmatmul.mubr.msk.bf16.gmra.mrb[12].mxu0 %vm83_vm1, %v50_v19  ;;  %674 = vmatprep.subr.bf16.mxu0 %v785_v1 }
  0x22   :  { %626 = vmatprep.mubr.msk.bf16.mxu0 %vm786_vm0, %v785_v1  ;;  %736 = vmatprep.subr.bf16.mxu1 %v785_v1 }
  0x24   :  { %675 = vmatpush3.bf16.msra.mxu0 %v759_v44  ;;  %744 = vmatpush3.bf16.msra.mxu1 %v759_v44 }
  0x25   :  { %676 = vmatprep.subr.bf16.mxu0 %v785_v1  ;;  %737 = vmatprep.subr.bf16.mxu1 %v785_v1 }
  0x28   :  { %677 = vmatpush3.bf16.msra.mxu0 %v760_v46  ;;  %745 = vmatpush3.bf16.msra.mxu1 %v760_v46 }
  0x29   :  { %627 = vmatmul.mubr.msk.bf16.gmra.mrb[16].mxu0 %vm83_vm1, %v51_v23 }
  0x2a   :  { %630 = vmatprep.mubr.msk.bf16.mxu0 %vm786_vm0, %v785_v1 }
  0x31   :  { %631 = vmatmul.mubr.msk.bf16.gmra.mrb[20].mxu0 %vm83_vm1, %v52_v26 }
  0x32   :  { %634 = vmatprep.mubr.msk.bf16.mxu0 %vm786_vm0, %v785_v1 }
  0x39   :  { %635 = vmatmul.mubr.msk.bf16.gmra.mrb[24].mxu0 %vm83_vm1, %v53_v29 }
  0x3a   :  { %638 = vmatprep.mubr.msk.bf16.mxu0 %vm786_vm0, %v785_v1 }
  0x41   :  { %639 = vmatmul.mubr.msk.bf16.gmra.mrb[28].mxu0 %vm83_vm1, %v54_v32 }
  0x42   :  { %642 = vmatprep.mubr.msk.bf16.mxu0 %vm786_vm0, %v785_v1 }
  0x49   :  { %643 = vmatmul.mubr.msk.bf16.gmra.mrb[32].mxu0 %vm83_vm1, %v55_v35 }
  0x4a   :  { %646 = vmatprep.mubr.msk.bf16.mxu0 %vm786_vm0, %v785_v1 }
  0x51   :  { %647 = vmatmul.mubr.msk.bf16.gmra.mrb[36].mxu0 %vm83_vm1, %v56_v38 }
  0x52   :  { %650 = vmatprep.mubr.msk.bf16.mxu0 %vm786_vm0, %v785_v1 }
  0x59   :  { %651 = vmatmul.mubr.msk.bf16.gmra.mrb[40].mxu0 %vm83_vm1, %v57_v41 }
  0x5a   :  { %654 = vmatprep.mubr.msk.bf16.mxu0 %vm786_vm0, %v785_v1 }
  0x61   :  { %655 = vmatmul.mubr.msk.bf16.gmra.mrb[44].mxu0 %vm83_vm1, %v58_v45 }
  0x62   :  { %658 = vmatprep.mubr.msk.bf16.mxu0 %vm786_vm0, %v785_v1 }
  0x69   :  { %659 = vmatmul.mubr.msk.bf16.gmra.mrb[48].mxu0 %vm83_vm1, %v59_v48 }
  0x6a   :  { %678 = vmatprep.mubr.msk.bf16.mxu0 %vm786_vm0, %v785_v1 }
  0xdc   :  { %v157_v50 = vpop.f32.mrb[0].mxu0 }
  0xdd   :  { %v158_v51 = vadd.f32 %v989_v49, %v157_v50  ;;  %v612_v52 = vpop.f32.mrb[1].mxu0 }
  0xde   :  { %v160_v53 = vpop.f32.mrb[2].mxu0 }
  0xdf   :  { %v161_v54 = vadd.f32 %v989_v49, %v160_v53  ;;  %v613_v55 = vpop.f32.mrb[3].mxu0  ;;  %v259_v56 = vmax.f32 %v158_v51, 0.0 }
  0xe1   :  { %v260_v57 = vmax.f32 %v161_v54, 0.0 }
  0xe3   :  { %v284_v58 = vpack.c.bf16 %v260_v57, %v259_v56 }
  0xe4   :  { %v165_v59 = vpop.f32.mrb[4].mxu0 }
  0xe5   :  { %v166_v60 = vadd.f32 %v989_v49, %v165_v59  ;;  %v616_v61 = vpop.f32.mrb[5].mxu0  ;;  %679 = vmatmul.mubr.bf16.vlgmr.msra.gmra.mrb[52].mxu0 %v284_v58 }
  0xe6   :  { %v168_v62 = vpop.f32.mrb[6].mxu0 }
  0xe7   :  { %v169_v63 = vadd.f32 %v989_v49, %v168_v62  ;;  %v617_v0 = vpop.f32.mrb[7].mxu0  ;;  %v261_v2 = vmax.f32 %v166_v60, 0.0 }
  0xe9   :  { %v262_v3 = vmax.f32 %v169_v63, 0.0 }
  0xeb   :  { %v285_v4 = vpack.c.bf16 %v262_v3, %v261_v2 }
  0xec   :  { %v173_v5 = vpop.f32.mrb[8].mxu0 }
  0xed   :  { %v174_v6 = vadd.f32 %v989_v49, %v173_v5  ;;  %v620_v7 = vpop.f32.mrb[9].mxu0  ;;  %683 = vmatmul.mubr.bf16.vlgmr.msra.gmra.mrb[0].mxu1 %v285_v4 }
  0xee   :  { %v176_v8 = vpop.f32.mrb[10].mxu0  ;;  %686 = vmatprep.mubr.msk.bf16.mxu1 %vm786_vm0, %v785_v1 }
  0xef   :  { %v177_v9 = vadd.f32 %v989_v49, %v176_v8  ;;  %v621_v10 = vpop.f32.mrb[11].mxu0  ;;  %v263_v11 = vmax.f32 %v174_v6, 0.0 }
  0xf1   :  { %v264_v12 = vmax.f32 %v177_v9, 0.0 }
  0xf3   :  { %v286_v13 = vpack.c.bf16 %v264_v12, %v263_v11 }
  0xf4   :  { %v181_v14 = vpop.f32.mrb[12].mxu0 }
  0xf5   :  { %v182_v15 = vadd.f32 %v989_v49, %v181_v14  ;;  %v624_v16 = vpop.f32.mrb[13].mxu0  ;;  %687 = vmatmul.mubr.bf16.gmra.mrb[4].mxu1 %v286_v13 }
  0xf6   :  { %v184_v17 = vpop.f32.mrb[14].mxu0  ;;  %690 = vmatprep.mubr.msk.bf16.mxu1 %vm786_vm0, %v785_v1 }
  0xf7   :  { %v185_v18 = vadd.f32 %v989_v49, %v184_v17  ;;  %v625_v19 = vpop.f32.mrb[15].mxu0  ;;  %v265_v20 = vmax.f32 %v182_v15, 0.0 }
  0xf9   :  { %v266_v21 = vmax.f32 %v185_v18, 0.0 }
  0xfb   :  { %v287_v22 = vpack.c.bf16 %v266_v21, %v265_v20 }
  0xfc   :  { %v189_v23 = vpop.f32.mrb[16].mxu0 }
  0xfd   :  { %v190_v24 = vadd.f32 %v989_v49, %v189_v23  ;;  %v628_v25 = vpop.f32.mrb[17].mxu0  ;;  %691 = vmatmul.mubr.bf16.gmra.mrb[8].mxu1 %v287_v22 }
  0xfe   :  { %v192_v26 = vpop.f32.mrb[18].mxu0  ;;  %694 = vmatprep.mubr.msk.bf16.mxu1 %vm786_vm0, %v785_v1 }
  0xff   :  { %v193_v27 = vadd.f32 %v989_v49, %v192_v26  ;;  %v629_v28 = vpop.f32.mrb[19].mxu0  ;;  %v267_v29 = vmax.f32 %v190_v24, 0.0 }
 0x101   :  { %v268_v30 = vmax.f32 %v193_v27, 0.0 }
 0x103   :  { %v288_v31 = vpack.c.bf16 %v268_v30, %v267_v29 }
 0x104   :  { %v197_v32 = vpop.f32.mrb[20].mxu0 }
 0x105   :  { %v198_v33 = vadd.f32 %v989_v49, %v197_v32  ;;  %v632_v34 = vpop.f32.mrb[21].mxu0  ;;  %695 = vmatmul.mubr.bf16.gmra.mrb[12].mxu1 %v288_v31 }
 0x106   :  { %v200_v35 = vpop.f32.mrb[22].mxu0  ;;  %698 = vmatprep.mubr.msk.bf16.mxu1 %vm786_vm0, %v785_v1 }
 0x107   :  { %v201_v36 = vadd.f32 %v989_v49, %v200_v35  ;;  %v633_v37 = vpop.f32.mrb[23].mxu0  ;;  %v269_v38 = vmax.f32 %v198_v33, 0.0 }
 0x109   :  { %v270_v39 = vmax.f32 %v201_v36, 0.0 }
 0x10b   :  { %v289_v40 = vpack.c.bf16 %v270_v39, %v269_v38 }
 0x10c   :  { %v205_v41 = vpop.f32.mrb[24].mxu0 }
 0x10d   :  { %v206_v42 = vadd.f32 %v989_v49, %v205_v41  ;;  %v636_v43 = vpop.f32.mrb[25].mxu0  ;;  %699 = vmatmul.mubr.bf16.gmra.mrb[16].mxu1 %v289_v40  ;;  %v1041_v40 = vld [vmem:[%s1084_s4] ss:$0 sm:$0xff]  ;;  %s534_s4 = sshll.u32 %s787_s3, 4  ;;  %s535_s4 = int_to_ptr.vmem [resolvable:$true] %s534_s4 }
 0x10e   :  { %v208_v44 = vpop.f32.mrb[26].mxu0  ;;  %702 = vmatprep.mubr.msk.bf16.mxu1 %vm786_vm0, %v785_v1  ;;  %s761_s12 = scalar_lea.vmem %s535_s4, 3200  ;;  %p766_p1 = scmp.lt.s32.totalorder %s535_s4, %s535_s4 }
 0x10f   :  { %v209_v45 = vadd.f32 %v989_v49, %v208_v44  ;;  %v637_v46 = vpop.f32.mrb[27].mxu0  ;;  %v271_v47 = vmax.f32 %v206_v42, 0.0  ;;  %p762_p0 = scmp.ne.s32.totalorder %s535_s4, %s761_s12  ;;  %p767_p2 = scmp.lt.s32.totalorder %s761_s12, %s761_s12 }
 0x111   :  { %v272_v48 = vmax.f32 %v209_v45, 0.0  ;;  %p768_p3 = por %p767_p2, %p766_p1 }
 0x113   :  { %v290_v50 = vpack.c.bf16 %v272_v48, %v271_v47  ;;  %p769_p4 = pnand %p768_p3, %p762_p0 }
 0x114   :  { %v213_v51 = vpop.f32.mrb[28].mxu0 }
 0x115   :  { %v214_v52 = vadd.f32 %v989_v49, %v213_v51  ;;  %v640_v53 = vpop.f32.mrb[29].mxu0  ;;  %703 = vmatmul.mubr.bf16.gmra.mrb[20].mxu1 %v290_v50 }
 0x116   :  { %v216_v54 = vpop.f32.mrb[30].mxu0  ;;  %706 = vmatprep.mubr.msk.bf16.mxu1 %vm786_vm0, %v785_v1 }
 0x117   :  { %v217_v55 = vadd.f32 %v989_v49, %v216_v54  ;;  %v641_v56 = vpop.f32.mrb[31].mxu0  ;;  %v273_v57 = vmax.f32 %v214_v52, 0.0 }
 0x119   :  { %v274_v58 = vmax.f32 %v217_v55, 0.0 }
 0x11b   :  { %v291_v59 = vpack.c.bf16 %v274_v58, %v273_v57 }
 0x11c   :  { %v221_v60 = vpop.f32.mrb[32].mxu0 }
 0x11d   :  { %v222_v61 = vadd.f32 %v989_v49, %v221_v60  ;;  %v644_v62 = vpop.f32.mrb[33].mxu0  ;;  %707 = vmatmul.mubr.bf16.gmra.mrb[24].mxu1 %v291_v59 }
 0x11e   :  { %v224_v63 = vpop.f32.mrb[34].mxu0  ;;  %710 = vmatprep.mubr.msk.bf16.mxu1 %vm786_vm0, %v785_v1 }
 0x11f   :  { %v225_v0 = vadd.f32 %v989_v49, %v224_v63  ;;  %v645_v2 = vpop.f32.mrb[35].mxu0  ;;  %v275_v3 = vmax.f32 %v222_v61, 0.0 }
 0x121   :  { %v276_v4 = vmax.f32 %v225_v0, 0.0 }
 0x123   :  { %v292_v5 = vpack.c.bf16 %v276_v4, %v275_v3 }
 0x124   :  { %v229_v6 = vpop.f32.mrb[36].mxu0 }
 0x125   :  { %v230_v7 = vadd.f32 %v989_v49, %v229_v6  ;;  %v648_v8 = vpop.f32.mrb[37].mxu0  ;;  %711 = vmatmul.mubr.bf16.gmra.mrb[28].mxu1 %v292_v5 }
 0x126   :  { %v232_v9 = vpop.f32.mrb[38].mxu0  ;;  %714 = vmatprep.mubr.msk.bf16.mxu1 %vm786_vm0, %v785_v1 }
 0x127   :  { %v233_v10 = vadd.f32 %v989_v49, %v232_v9  ;;  %v649_v11 = vpop.f32.mrb[39].mxu0  ;;  %v277_v12 = vmax.f32 %v230_v7, 0.0 }
 0x129   :  { %v278_v13 = vmax.f32 %v233_v10, 0.0 }
 0x12b   :  { %v293_v14 = vpack.c.bf16 %v278_v13, %v277_v12 }
 0x12c   :  { %v237_v15 = vpop.f32.mrb[40].mxu0 }
 0x12d   :  { %v238_v16 = vadd.f32 %v989_v49, %v237_v15  ;;  %v652_v17 = vpop.f32.mrb[41].mxu0  ;;  %715 = vmatmul.mubr.bf16.gmra.mrb[32].mxu1 %v293_v14 }
 0x12e   :  { %v240_v18 = vpop.f32.mrb[42].mxu0  ;;  %718 = vmatprep.mubr.msk.bf16.mxu1 %vm786_vm0, %v785_v1 }
 0x12f   :  { %v241_v19 = vadd.f32 %v989_v49, %v240_v18  ;;  %v653_v20 = vpop.f32.mrb[43].mxu0  ;;  %v279_v21 = vmax.f32 %v238_v16, 0.0 }
 0x131   :  { %v280_v22 = vmax.f32 %v241_v19, 0.0 }
 0x133   :  { %v294_v23 = vpack.c.bf16 %v280_v22, %v279_v21 }
 0x134   :  { %v245_v24 = vpop.f32.mrb[44].mxu0 }
 0x135   :  { %v246_v25 = vadd.f32 %v989_v49, %v245_v24  ;;  %v656_v26 = vpop.f32.mrb[45].mxu0  ;;  %719 = vmatmul.mubr.bf16.gmra.mrb[36].mxu1 %v294_v23 }
 0x136   :  { %v248_v27 = vpop.f32.mrb[46].mxu0  ;;  %722 = vmatprep.mubr.msk.bf16.mxu1 %vm786_vm0, %v785_v1 }
 0x137   :  { %v249_v28 = vadd.f32 %v989_v49, %v248_v27  ;;  %v657_v29 = vpop.f32.mrb[47].mxu0  ;;  %v281_v30 = vmax.f32 %v246_v25, 0.0 }
 0x139   :  { %v282_v31 = vmax.f32 %v249_v28, 0.0 }
 0x13b   :  { %v295_v32 = vpack.c.bf16 %v282_v31, %v281_v30 }
 0x13c   :  { %v253_v33 = vpop.f32.mrb[48].mxu0 }
 0x13d   :  { %v254_v34 = vadd.f32 %v989_v49, %v253_v33  ;;  %v660_v35 = vpop.f32.mrb[49].mxu0  ;;  %723 = vmatmul.mubr.bf16.gmra.mrb[40].mxu1 %v295_v32 }
 0x13e   :  { %v256_v36 = vpop.f32.mrb[50].mxu0  ;;  %726 = vmatprep.mubr.msk.bf16.mxu1 %vm786_vm0, %v785_v1 }
 0x13f   :  { %v283_v37 = vmax.f32 %v254_v34, 0.0  ;;  %v661_v38 = vpop.f32.mrb[51].mxu0 }
 0x141   :  { %v296_v39 = vpack.c.bf16 %v283_v37, %v283_v37 }
 0x145   :  { %727 = vmatmul.mubr.bf16.gmra.mrb[44].mxu1 %v296_v39 }
 0x1b8   :  { %v402_v41 = vpop.f32.mrb[52].mxu0 }
 0x1b9   :  { %v403_v42 = vadd.f32 %v1041_v40, %v402_v41  ;;  %v680_v43 = vpop.f32.mrb[53].mxu0 }
 0x1ba   :  { %v405_v49 = vpop.f32.mrb[54].mxu0 }
 0x1bb   :  { %504 = vst [vmem:[#allocation2] sm:$0xff] %v403_v42  ;;  %v406_v44 = vadd.f32 %v1041_v40, %v405_v49  ;;  %v681_v45 = vpop.f32.mrb[55].mxu0 }
 0x1bd   :  { %505 = vst [vmem:[#allocation2 + $0x8] sm:$0xff] %v406_v44 }
 0x1c0   :  { %v410_v1 = vpop.f32.mrb[0].mxu1 }
 0x1c1   :  { %v411_v46 = vadd.f32 %v1041_v40, %v410_v1  ;;  %v684_v47 = vpop.f32.mrb[1].mxu1 }
 0x1c2   :  { %v413_v48 = vpop.f32.mrb[2].mxu1 }
 0x1c3   :  { %506 = vst [vmem:[#allocation2 + $0x10] sm:$0xff] %v411_v46  ;;  %v414_v50 = vadd.f32 %v1041_v40, %v413_v48  ;;  %v685_v51 = vpop.f32.mrb[3].mxu1 }
 0x1c5   :  { %507 = vst [vmem:[#allocation2 + $0x18] sm:$0xff] %v414_v50 }
 0x1c8   :  { %v418_v52 = vpop.f32.mrb[4].mxu1 }
 0x1c9   :  { %v419_v53 = vadd.f32 %v1041_v40, %v418_v52  ;;  %v688_v54 = vpop.f32.mrb[5].mxu1 }
 0x1ca   :  { %v421_v55 = vpop.f32.mrb[6].mxu1 }
 0x1cb   :  { %508 = vst [vmem:[#allocation2 + $0x20] sm:$0xff] %v419_v53  ;;  %v422_v56 = vadd.f32 %v1041_v40, %v421_v55  ;;  %v689_v57 = vpop.f32.mrb[7].mxu1 }
 0x1cd   :  { %509 = vst [vmem:[#allocation2 + $0x28] sm:$0xff] %v422_v56 }
 0x1d0   :  { %v426_v58 = vpop.f32.mrb[8].mxu1 }
 0x1d1   :  { %v427_v59 = vadd.f32 %v1041_v40, %v426_v58  ;;  %v692_v60 = vpop.f32.mrb[9].mxu1 }
 0x1d2   :  { %v429_v61 = vpop.f32.mrb[10].mxu1 }
 0x1d3   :  { %510 = vst [vmem:[#allocation2 + $0x30] sm:$0xff] %v427_v59  ;;  %v430_v62 = vadd.f32 %v1041_v40, %v429_v61  ;;  %v693_v63 = vpop.f32.mrb[11].mxu1 }
 0x1d5   :  { %511 = vst [vmem:[#allocation2 + $0x38] sm:$0xff] %v430_v62 }
 0x1d8   :  { %v434_v0 = vpop.f32.mrb[12].mxu1 }
 0x1d9   :  { %v435_v2 = vadd.f32 %v1041_v40, %v434_v0  ;;  %v696_v3 = vpop.f32.mrb[13].mxu1 }
 0x1da   :  { %v437_v4 = vpop.f32.mrb[14].mxu1 }
 0x1db   :  { %512 = vst [vmem:[#allocation2 + $0x40] sm:$0xff] %v435_v2  ;;  %v438_v5 = vadd.f32 %v1041_v40, %v437_v4  ;;  %v697_v6 = vpop.f32.mrb[15].mxu1 }
 0x1dd   :  { %513 = vst [vmem:[#allocation2 + $0x48] sm:$0xff] %v438_v5 }
 0x1e0   :  { %v442_v7 = vpop.f32.mrb[16].mxu1 }
 0x1e1   :  { %v443_v8 = vadd.f32 %v1041_v40, %v442_v7  ;;  %v700_v9 = vpop.f32.mrb[17].mxu1 }
 0x1e2   :  { %v445_v10 = vpop.f32.mrb[18].mxu1 }
 0x1e3   :  { %514 = vst [vmem:[#allocation2 + $0x50] sm:$0xff] %v443_v8  ;;  %v446_v11 = vadd.f32 %v1041_v40, %v445_v10  ;;  %v701_v12 = vpop.f32.mrb[19].mxu1 }
 0x1e5   :  { %515 = vst [vmem:[#allocation2 + $0x58] sm:$0xff] %v446_v11 }
 0x1e8   :  { %v450_v13 = vpop.f32.mrb[20].mxu1 }
 0x1e9   :  { %v451_v14 = vadd.f32 %v1041_v40, %v450_v13  ;;  %v704_v15 = vpop.f32.mrb[21].mxu1 }
 0x1ea   :  { %v453_v16 = vpop.f32.mrb[22].mxu1 }
 0x1eb   :  { %516 = vst [vmem:[#allocation2 + $0x60] sm:$0xff] %v451_v14  ;;  %v454_v17 = vadd.f32 %v1041_v40, %v453_v16  ;;  %v705_v18 = vpop.f32.mrb[23].mxu1 }
 0x1ed   :  { %517 = vst [vmem:[#allocation2 + $0x68] sm:$0xff] %v454_v17 }
 0x1f0   :  { %v458_v19 = vpop.f32.mrb[24].mxu1 }
 0x1f1   :  { %v459_v20 = vadd.f32 %v1041_v40, %v458_v19  ;;  %v708_v21 = vpop.f32.mrb[25].mxu1 }
 0x1f2   :  { %v461_v22 = vpop.f32.mrb[26].mxu1 }
 0x1f3   :  { %518 = vst [vmem:[#allocation2 + $0x70] sm:$0xff] %v459_v20  ;;  %v462_v23 = vadd.f32 %v1041_v40, %v461_v22  ;;  %v709_v24 = vpop.f32.mrb[27].mxu1 }
 0x1f5   :  { %519 = vst [vmem:[#allocation2 + $0x78] sm:$0xff] %v462_v23 }
 0x1f8   :  { %v466_v25 = vpop.f32.mrb[28].mxu1 }
 0x1f9   :  { %v467_v26 = vadd.f32 %v1041_v40, %v466_v25  ;;  %v712_v27 = vpop.f32.mrb[29].mxu1 }
 0x1fa   :  { %v469_v28 = vpop.f32.mrb[30].mxu1 }
 0x1fb   :  { %520 = vst [vmem:[#allocation2 + $0x80] sm:$0xff] %v467_v26  ;;  %v470_v29 = vadd.f32 %v1041_v40, %v469_v28  ;;  %v713_v30 = vpop.f32.mrb[31].mxu1 }
 0x1fd   :  { %521 = vst [vmem:[#allocation2 + $0x88] sm:$0xff] %v470_v29 }
 0x200   :  { %v474_v31 = vpop.f32.mrb[32].mxu1 }
 0x201   :  { %v475_v32 = vadd.f32 %v1041_v40, %v474_v31  ;;  %v716_v33 = vpop.f32.mrb[33].mxu1 }
 0x202   :  { %v477_v34 = vpop.f32.mrb[34].mxu1 }
 0x203   :  { %522 = vst [vmem:[#allocation2 + $0x90] sm:$0xff] %v475_v32  ;;  %v478_v35 = vadd.f32 %v1041_v40, %v477_v34  ;;  %v717_v36 = vpop.f32.mrb[35].mxu1 }
 0x205   :  { %523 = vst [vmem:[#allocation2 + $0x98] sm:$0xff] %v478_v35 }
 0x208   :  { %v482_v37 = vpop.f32.mrb[36].mxu1 }
 0x209   :  { %v483_v38 = vadd.f32 %v1041_v40, %v482_v37  ;;  %v720_v39 = vpop.f32.mrb[37].mxu1 }
 0x20a   :  { %v485_v41 = vpop.f32.mrb[38].mxu1 }
 0x20b   :  { %524 = vst [vmem:[#allocation2 + $0xa0] sm:$0xff] %v483_v38  ;;  %v486_v42 = vadd.f32 %v1041_v40, %v485_v41  ;;  %v721_v43 = vpop.f32.mrb[39].mxu1 }
 0x20d   :  { %525 = vst [vmem:[#allocation2 + $0xa8] sm:$0xff] %v486_v42 }
 0x210   :  { %v490_v49 = vpop.f32.mrb[40].mxu1 }
 0x211   :  { %v491_v44 = vadd.f32 %v1041_v40, %v490_v49  ;;  %v724_v45 = vpop.f32.mrb[41].mxu1 }
 0x212   :  { %v493_v1 = vpop.f32.mrb[42].mxu1 }
 0x213   :  { %526 = vst [vmem:[#allocation2 + $0xb0] sm:$0xff] %v491_v44  ;;  %v494_v46 = vadd.f32 %v1041_v40, %v493_v1  ;;  %v725_v47 = vpop.f32.mrb[43].mxu1 }
 0x215   :  { %527 = vst [vmem:[#allocation2 + $0xb8] sm:$0xff] %v494_v46 }
 0x218   :  { %v498_v48 = vpop.f32.mrb[44].mxu1 }
 0x219   :  { %v499_v50 = vadd.f32 %v1041_v40, %v498_v48  ;;  %v728_v51 = vpop.f32.mrb[45].mxu1 }
 0x21a   :  { %v501_v52 = vpop.f32.mrb[46].mxu1 }
 0x21b   :  { %528 = vst [vmem:[#allocation2 + $0xc0] sm:$0xff] %v499_v50  ;;  %v729_v53 = vpop.f32.mrb[47].mxu1 }
 0x21c   :  { %772 = shalt.err (!%p769_p4)
}
 0x21d   :  { %s773_s15 = scalar_lea.hbm %s1085_s5, 3200 }
 0x21e   :  { %p774_p5 = scmp.ne.s32.totalorder %s1085_s5, %s773_s15  ;;  %p777_p6 = scmp.lt.u32.totalorder %s773_s15, %s1085_s5 }
 0x220   :  { %p779_p7 = pnand %p777_p6, %p774_p5 }
 0x222   :  { %782 = shalt.err (!%p779_p7)
}
 0x223   :  { %s788_s20 = smov 128   ;;  %s789_s21 = smov 8  }
 0x224   :  { %540 = dma.vmem_to_hbm [thread:$0]  %s535_s4, 3200, %s1085_s5, [#allocation3], %s788_s20, %s788_s20, %s789_s21  }
 0x225   :  { %783 = dma.done.wait [#allocation3], 3200  }
 0x226   :  { %784 = vsyncadd [#allocation3], 4294964096 }
 0x227   :  { %544 = vsyncpa [#allocation3], 1 }

</bundles_post_ra>
